<compile_context>
chip_gen: v5e
topology: v5e:2x2
jax: 0.10.0
libtpu: 0.0.40
codegen_flags: <defaults>
</compile_context>

<pallas_src>
import jax
import jax.numpy as jnp
from jax.experimental import pallas as pl
from jax.experimental.pallas import tpu as pltpu


def _cdiv(a, b):
    return -(-a // b)


def _round_up(x, m):
    return ((x + m - 1) // m) * m


def _tversky_partial_kernel(x_ref, t_ref, o_ref, acc_ref):
    s = pl.program_id(2)
    ns = pl.num_programs(2)

    @pl.when(s == 0)
    def _():
        acc_ref[...] = jnp.zeros_like(acc_ref)

    x = x_ref[0].astype(jnp.float32)   # (C, R, 128) logits
    t = t_ref[0].astype(jnp.float32)   # (R, 128) target mask
    C = x.shape[0]
    R = x.shape[1]

    # p1 = softmax(x)[1] = 1 / (1 + sum_{c != 1} exp(x_c - x_1)).
    # Class 1's exp(0) = 1 term is folded in without an exp (saves EUP issue).
    # Overflow of another class -> inf -> p1 = 0 (benign; matches softmax to
    # within f32 eps).
    x1 = x[1]
    denom = jnp.ones_like(x1)
    for c in range(C):                 # static unroll, C is small
        if c != 1:
            denom = denom + jnp.exp(x[c] - x1)
    p = 1.0 / denom                    # exact divide (keeps 1e-5 tolerance)

    # Fold (R, 128) tiles into one (8, 128) vreg slab with plain VPU adds.
    # The reshape respects (8, 128) tile boundaries -> no data movement.
    def fold(v):
        return v.reshape(R // 8, 8, 128).sum(axis=0)

    acc_ref[0:8] = acc_ref[0:8] + fold(p * t)      # intersection partials
    acc_ref[8:16] = acc_ref[8:16] + fold(p)        # sum of predictions
    acc_ref[16:24] = acc_ref[16:24] + fold(t)      # sum of targets

    @pl.when(s == ns - 1)
    def _():
        o_ref[0, 0] = acc_ref[...]


def tversky_loss(inputs, targets, smooth=1.0, alpha=0.5, beta=0.5,
                 max_block_bytes=8 * 1024 * 1024, spatial_chunks=None):
    """inputs: (N, C, H, W) logits (f32/bf16); targets: (N, H, W) mask
    (f32/bf16/int — 0/1 values). Returns the scalar mean Tversky loss."""
    N, C, H, W = inputs.shape
    if C < 2:
        raise ValueError("TverskyLoss NCHW path requires at least 2 classes")
    HW = H * W

    rows = _cdiv(HW, 128)              # spatial positions / lane width

    # Optional parallel spatial-chunk axis (helps v7x's 2 TensorCores at small N).
    if spatial_chunks is None:
        spatial_chunks = 2 if N == 1 else 1
    n_chunks = max(1, min(spatial_chunks, _cdiv(rows, 8)))

    x_item = jnp.dtype(inputs.dtype).itemsize
    t_item = jnp.dtype(targets.dtype).itemsize

    # Rows per spatial tile: multiple of 8, logits block <= max_block_bytes.
    r_budget = max(8, (max_block_bytes // (C * 128 * x_item)) // 8 * 8)
    rows_per_chunk = _round_up(_cdiv(rows, n_chunks), 8)
    R = min(r_budget, rows_per_chunk)
    n_s = _cdiv(rows_per_chunk, R)
    rows_p = n_chunks * n_s * R
    hw_p = rows_p * 128

    x = inputs.reshape(N, C, HW)
    t = targets.reshape(N, HW)
    if hw_p != HW:
        x = jnp.pad(x, ((0, 0), (0, 0), (0, hw_p - HW)))
        t = jnp.pad(t, ((0, 0), (0, hw_p - HW)))
    x = x.reshape(N, C, rows_p, 128)
    t = t.reshape(N, rows_p, 128)

    # Right-size the scoped VMEM limit: double-buffered inputs + output + acc
    # + margin (never request the whole 64 MiB of a v7x TensorCore).
    x_blk = C * R * 128 * x_item
    t_blk = R * 128 * t_item
    out_blk = 24 * 128 * 4
    vmem_limit = 2 * (x_blk + t_blk) + 2 * out_blk + out_blk + (4 << 20)
    vmem_limit = int(min(max(vmem_limit, 4 << 20), 48 << 20))

    out = pl.pallas_call(
        _tversky_partial_kernel,
        out_shape=jax.ShapeDtypeStruct((N, n_chunks, 24, 128), jnp.float32),
        grid_spec=pltpu.PrefetchScalarGridSpec(
            num_scalar_prefetch=0,
            grid=(N, n_chunks, n_s),
            in_specs=[
                pl.BlockSpec((1, C, R, 128),
                             lambda b, c, s: (b, 0, c * n_s + s, 0)),
                pl.BlockSpec((1, R, 128),
                             lambda b, c, s: (b, c * n_s + s, 0)),
            ],
            out_specs=pl.BlockSpec((1, 1, 24, 128),
                                   lambda b, c, s: (b, c, 0, 0)),
            scratch_shapes=[pltpu.VMEM((24, 128), jnp.float32)],
        ),
        compiler_params=pltpu.CompilerParams(
            dimension_semantics=("parallel", "parallel", "arbitrary"),
            vmem_limit_bytes=vmem_limit,
        ),
    )(x, t)

    # Tiny wrapper-side reduce: (N, chunks, 3, 8, 128) partials -> (N, 3).
    parts = jnp.sum(out.reshape(N, n_chunks, 3, 8, 128), axis=(1, 3, 4))
    inter = parts[:, 0]
    # Zero-padded logits give p1 = 1/C exactly at every padded position (and
    # targets are zero-padded), so correct sum_p algebraically here instead of
    # masking in the hot loop.
    sum_p = parts[:, 1] - (hw_p - HW) / C
    sum_t = parts[:, 2]
    fps = sum_p - inter
    fns = sum_t - inter
    tversky = (inter + smooth) / (inter + alpha * fps + beta * fns + smooth)
    return jnp.mean(1.0 - tversky)


def _reference(inputs, targets, smooth=1.0, alpha=0.5, beta=0.5):
    p = jax.nn.softmax(inputs.astype(jnp.float32), axis=1)[:, 1, :, :]
    tg = targets.astype(jnp.float32)
    inter = jnp.sum(p * tg, axis=(1, 2))
    fps = jnp.sum(p * (1.0 - tg), axis=(1, 2))
    fns = jnp.sum((1.0 - p) * tg, axis=(1, 2))
    tv = (inter + smooth) / (inter + alpha * fps + beta * fns + smooth)
    return jnp.mean(1.0 - tv)


if __name__ == "__main__":
    key = jax.random.PRNGKey(0)

    def check(N, C, H, W, dtype=jnp.float32, target_dtype=jnp.float32, **kw):
        k1, k2 = jax.random.split(jax.random.fold_in(key, N * 1000 + C * 100 + H))
        x = jax.random.normal(k1, (N, C, H, W), dtype=jnp.float32).astype(dtype)
        t = (jax.random.uniform(k2, (N, H, W)) > 0.5).astype(target_dtype)
        got = jax.block_until_ready(tversky_loss(x, t, **kw))
        want = _reference(x, t)
        assert jnp.allclose(got, want, atol=1e-5), (N, C, H, W, got, want)

    check(2, 4, 16, 16)                                   # base case, one tile
    check(2, 3, 7, 9)                                     # padding correction path
    check(2, 4, 48, 48, max_block_bytes=8192)             # multi-step spatial accumulation
    check(2, 4, 48, 48, spatial_chunks=2)                 # parallel spatial-chunk axis
    check(1, 4, 48, 48)                                   # N=1 -> auto 2 chunks (v7x path)
    check(2, 4, 16, 16, dtype=jnp.bfloat16)               # bf16 logits, f32 in-kernel math
    check(2, 4, 16, 16, target_dtype=jnp.bfloat16)        # bf16 targets (fewer HBM bytes)
    print("KERNEL_OK")
</pallas_src>

<mosaic_0001>
module attributes {stable_mosaic.version = 11 : i64} {
  func.func @_tversky_partial_kernel(%arg0: i32, %arg1: i32, %arg2: i32, %arg3: memref<1x4x8x128xf32, #tpu.memory_space<vmem>>, %arg4: memref<1x8x128xf32, #tpu.memory_space<vmem>>, %arg5: memref<1x1x24x128xf32, #tpu.memory_space<vmem>>, %arg6: memref<24x128xf32, #tpu.memory_space<vmem>>) attributes {dimension_semantics = [#tpu.dimension_semantics<parallel>, #tpu.dimension_semantics<parallel>, #tpu.dimension_semantics<arbitrary>], iteration_bounds = array<i64: 2, 1, 1>, scalar_prefetch = 0 : i64, scratch_operands = 1 : i64, tpu.core_type = #tpu.core_type<tc>, window_params = [{transform_indices = @transform_0, window_bounds = array<i64: 1, 4, 8, 128>}, {transform_indices = @transform_1, window_bounds = array<i64: 1, 8, 128>}, {transform_indices = @transform_2, window_bounds = array<i64: 1, 1, 24, 128>}]} {
    %c0_i32 = arith.constant 0 : i32
    %0 = arith.cmpi eq, %arg2, %c0_i32 : i32
    %1 = arith.extui %0 : i1 to i32
    %c0_i32_0 = arith.constant 0 : i32
    %2 = arith.cmpi ne, %1, %c0_i32_0 : i32
    scf.if %2 {
      %cst_23 = arith.constant 0.000000e+00 : f32
      %46 = vector.broadcast %cst_23 : f32 to vector<24x128xf32>
      %c0_24 = arith.constant 0 : index
      %c0_25 = arith.constant 0 : index
      %47 = vector.load %arg6[%c0_24, %c0_25] : memref<24x128xf32, #tpu.memory_space<vmem>>, vector<24x128xf32>
      tpu.vector_store %arg6[%c0_24, %c0_25], %46 {strides = array<i32>} : memref<24x128xf32, #tpu.memory_space<vmem>>, vector<24x128xf32>,
    } else {
    }
    %c0 = arith.constant 0 : index
    %c0_1 = arith.constant 0 : index
    %c0_2 = arith.constant 0 : index
    %c0_3 = arith.constant 0 : index
    %3 = vector.load %arg3[%c0, %c0_1, %c0_2, %c0_3] : memref<1x4x8x128xf32, #tpu.memory_space<vmem>>, vector<1x4x8x128xf32>
    %4 = vector.shape_cast %3 : vector<1x4x8x128xf32> to vector<4x8x128xf32>
    %c0_4 = arith.constant 0 : index
    %c0_5 = arith.constant 0 : index
    %c0_6 = arith.constant 0 : index
    %5 = vector.load %arg4[%c0_4, %c0_5, %c0_6] : memref<1x8x128xf32, #tpu.memory_space<vmem>>, vector<1x8x128xf32>
    %6 = vector.shape_cast %5 : vector<1x8x128xf32> to vector<8x128xf32>
    %7 = vector.extract_strided_slice %4 {offsets = [1, 0, 0], sizes = [1, 8, 128], strides = [1, 1, 1]} : vector<4x8x128xf32> to vector<1x8x128xf32>
    %8 = vector.shape_cast %7 : vector<1x8x128xf32> to vector<8x128xf32>
    %cst = arith.constant 1.000000e+00 : f32
    %9 = vector.broadcast %cst : f32 to vector<8x128xf32>
    %10 = vector.extract_strided_slice %4 {offsets = [0, 0, 0], sizes = [1, 8, 128], strides = [1, 1, 1]} : vector<4x8x128xf32> to vector<1x8x128xf32>
    %11 = vector.shape_cast %10 : vector<1x8x128xf32> to vector<8x128xf32>
    %12 = arith.subf %11, %8 : vector<8x128xf32>
    %13 = math.exp %12 : vector<8x128xf32>
    %14 = arith.addf %9, %13 : vector<8x128xf32>
    %15 = vector.extract_strided_slice %4 {offsets = [2, 0, 0], sizes = [1, 8, 128], strides = [1, 1, 1]} : vector<4x8x128xf32> to vector<1x8x128xf32>
    %16 = vector.shape_cast %15 : vector<1x8x128xf32> to vector<8x128xf32>
    %17 = arith.subf %16, %8 : vector<8x128xf32>
    %18 = math.exp %17 : vector<8x128xf32>
    %19 = arith.addf %14, %18 : vector<8x128xf32>
    %20 = vector.extract_strided_slice %4 {offsets = [3, 0, 0], sizes = [1, 8, 128], strides = [1, 1, 1]} : vector<4x8x128xf32> to vector<1x8x128xf32>
    %21 = vector.shape_cast %20 : vector<1x8x128xf32> to vector<8x128xf32>
    %22 = arith.subf %21, %8 : vector<8x128xf32>
    %23 = math.exp %22 : vector<8x128xf32>
    %24 = arith.addf %19, %23 : vector<8x128xf32>
    %cst_7 = arith.constant 1.000000e+00 : f32
    %25 = vector.broadcast %cst_7 : f32 to vector<8x128xf32>
    %26 = arith.divf %25, %24 : vector<8x128xf32>
    %c0_8 = arith.constant 0 : index
    %c0_9 = arith.constant 0 : index
    %27 = vector.load %arg6[%c0_8, %c0_9] : memref<24x128xf32, #tpu.memory_space<vmem>>, vector<8x128xf32>
    %28 = arith.mulf %26, %6 : vector<8x128xf32>
    %29 = vector.shape_cast %28 : vector<8x128xf32> to vector<1x8x128xf32>
    %cst_10 = arith.constant dense<0.000000e+00> : vector<8x128xf32>
    %30 = vector.multi_reduction <add>, %29, %cst_10 [0] : vector<1x8x128xf32> to vector<8x128xf32>
    %31 = arith.addf %27, %30 : vector<8x128xf32>
    %c0_11 = arith.constant 0 : index
    %c0_12 = arith.constant 0 : index
    %32 = vector.load %arg6[%c0_11, %c0_12] : memref<24x128xf32, #tpu.memory_space<vmem>>, vector<8x128xf32>
    tpu.vector_store %arg6[%c0_11, %c0_12], %31 {strides = array<i32>} : memref<24x128xf32, #tpu.memory_space<vmem>>, vector<8x128xf32>,
    %c8 = arith.constant 8 : index
    %c0_13 = arith.constant 0 : index
    %33 = vector.load %arg6[%c8, %c0_13] : memref<24x128xf32, #tpu.memory_space<vmem>>, vector<8x128xf32>
    %34 = vector.shape_cast %26 : vector<8x128xf32> to vector<1x8x128xf32>
    %cst_14 = arith.constant dense<0.000000e+00> : vector<8x128xf32>
    %35 = vector.multi_reduction <add>, %34, %cst_14 [0] : vector<1x8x128xf32> to vector<8x128xf32>
    %36 = arith.addf %33, %35 : vector<8x128xf32>
    %c8_15 = arith.constant 8 : index
    %c0_16 = arith.constant 0 : index
    %37 = vector.load %arg6[%c8_15, %c0_16] : memref<24x128xf32, #tpu.memory_space<vmem>>, vector<8x128xf32>
    tpu.vector_store %arg6[%c8_15, %c0_16], %36 {strides = array<i32>} : memref<24x128xf32, #tpu.memory_space<vmem>>, vector<8x128xf32>,
    %c16 = arith.constant 16 : index
    %c0_17 = arith.constant 0 : index
    %38 = vector.load %arg6[%c16, %c0_17] : memref<24x128xf32, #tpu.memory_space<vmem>>, vector<8x128xf32>
    %39 = vector.shape_cast %6 : vector<8x128xf32> to vector<1x8x128xf32>
    %cst_18 = arith.constant dense<0.000000e+00> : vector<8x128xf32>
    %40 = vector.multi_reduction <add>, %39, %cst_18 [0] : vector<1x8x128xf32> to vector<8x128xf32>
    %41 = arith.addf %38, %40 : vector<8x128xf32>
    %c16_19 = arith.constant 16 : index
    %c0_20 = arith.constant 0 : index
    %42 = vector.load %arg6[%c16_19, %c0_20] : memref<24x128xf32, #tpu.memory_space<vmem>>, vector<8x128xf32>
    tpu.vector_store %arg6[%c16_19, %c0_20], %41 {strides = array<i32>} : memref<24x128xf32, #tpu.memory_space<vmem>>, vector<8x128xf32>,
    %c0_i32_21 = arith.constant 0 : i32
    %43 = arith.cmpi eq, %arg2, %c0_i32_21 : i32
    %44 = arith.extui %43 : i1 to i32
    %c0_i32_22 = arith.constant 0 : i32
    %45 = arith.cmpi ne, %44, %c0_i32_22 : i32
    scf.if %45 {
      %c0_23 = arith.constant 0 : index
      %c0_24 = arith.constant 0 : index
      %46 = vector.load %arg6[%c0_23, %c0_24] : memref<24x128xf32, #tpu.memory_space<vmem>>, vector<24x128xf32>
      %c0_25 = arith.constant 0 : index
      %c0_26 = arith.constant 0 : index
      %c0_27 = arith.constant 0 : index
      %c0_28 = arith.constant 0 : index
      %47 = vector.load %arg5[%c0_25, %c0_26, %c0_27, %c0_28] : memref<1x1x24x128xf32, #tpu.memory_space<vmem>>, vector<1x1x24x128xf32>
      %48 = vector.shape_cast %47 : vector<1x1x24x128xf32> to vector<24x128xf32>
      %49 = vector.shape_cast %46 : vector<24x128xf32> to vector<1x1x24x128xf32>
      tpu.vector_store %arg5[%c0_25, %c0_26, %c0_27, %c0_28], %49 {strides = array<i32>} : memref<1x1x24x128xf32, #tpu.memory_space<vmem>>, vector<1x1x24x128xf32>,
    } else {
    }
    return
  }
  func.func @transform_0(%arg0: i32, %arg1: i32, %arg2: i32) -> (i32, i32, i32, i32) {
    %c1_i32 = arith.constant 1 : i32
    %0 = arith.muli %arg1, %c1_i32 : i32
    %1 = arith.addi %0, %arg2 : i32
    %c0_i32 = arith.constant 0 : i32
    %c0_i32_0 = arith.constant 0 : i32
    %c0_i32_1 = arith.constant 0 : i32
    return %arg0, %c0_i32, %1, %c0_i32_0 : i32, i32, i32, i32
  }
  func.func @transform_1(%arg0: i32, %arg1: i32, %arg2: i32) -> (i32, i32, i32) {
    %c1_i32 = arith.constant 1 : i32
    %0 = arith.muli %arg1, %c1_i32 : i32
    %1 = arith.addi %0, %arg2 : i32
    %c0_i32 = arith.constant 0 : i32
    %c0_i32_0 = arith.constant 0 : i32
    return %arg0, %1, %c0_i32 : i32, i32, i32
  }
  func.func @transform_2(%arg0: i32, %arg1: i32, %arg2: i32) -> (i32, i32, i32, i32) {
    %c0_i32 = arith.constant 0 : i32
    %c0_i32_0 = arith.constant 0 : i32
    %c0_i32_1 = arith.constant 0 : i32
    return %arg0, %arg1, %c0_i32, %c0_i32_0 : i32, i32, i32, i32
  }
}

</mosaic_0001>

<bundles_post_ra>
// kernel: tpu_custom_call.1
= control target key start
LH: loop header
LB: loop body
LE: loop exit
PB: predicated region body
PF: predicated region fallthrough
CT: control target
= control target key end

     0   :  { %7 = vsyncpa [#allocation4], 0  ;;  %s841_s0 = inlined_call_operand.hbm [shape: f32[2,4,8,128], index: 0, kind: input, shape index: {}]   ;;  %s842_s1 = inlined_call_operand.hbm [shape: f32[2,8,128], index: 1, kind: input, shape index: {}]   ;;  %s843_s2 = inlined_call_operand.hbm [shape: f32[2,1,24,128], index: 2, kind: output, shape index: {}]  }
   0x1   :  { %9 = vsyncpa [#allocation4 + $0x1], 0 }
   0x2   :  { %10 = vsyncpa [#allocation7], 0 }
   0x3   :  { %12 = vsyncpa [#allocation7 + $0x1], 0 }
   0x4   :  { %13 = vsyncpa [#allocation5], 0 }
   0x5   :  { %15 = vsyncpa [#allocation5 + $0x1], 0  ;;  %s696_s9 = smov 0   ;;  %s698_s10 = smov 0  }
   0x6   :  { %s700_s11 = smov 0   ;;  %s702_s12 = smov 0  }
   0x7   :  { %s704_s13 = smov 0   ;;  %s706_s14 = smov 0  }
   0x8 LB: > { %s432_s15 = sadd.s32 4294967295, %s675_s14   ;;  %s433_s16 = sadd.s32 4294967294, %s675_s14   ;;  %s675_s14 = sphi %s706_s14, %s21_s14   ;;  %s671_s13 = sphi %s704_s13, %s853_s13   ;;  %s667_s12 = sphi %s702_s12, %s852_s12   ;;  %s663_s11 = sphi %s700_s11, %s851_s11   ;;  %s659_s10 = sphi %s698_s10, %s850_s10   ;;  %s655_s9 = sphi %s696_s9, %s849_s9  }
   0x9   : > { %s40_s17 = sadd.s32 1, %s671_s13  ;;  %s51_s18 = sadd.s32 1, %s663_s11 }
   0xa   : > { %p42_p0 = scmp.ge.s32.totalorder %s40_s17, 2  ;;  %p58_p1 = scmp.ne.s32.totalorder %s663_s11, %s659_s10 }
   0xb   : > { %p59_p2 = scmp.eq.s32.totalorder %s675_s14, 0  ;;  %p64_p3 = scmp.ne.s32.totalorder %s659_s10, %s655_s9 }
   0xc   : > { %s855_s17 = smov (%p42_p0, %s40_s17), 0  ;;  %p65_p5 = scmp.eq.s32.totalorder %s432_s15, 0 }
   0xd   : > { %p737_p4 = por %p59_p2, %p58_p1  ;;  %s46_s20 = ssub.s32 %s671_s13, %s855_s17 }
   0xe   : > { %p120_p6 = scmp.eq.s32.totalorder %s432_s15, 1  ;;  %p49_p7 = scmp.eq.s32.totalorder %s46_s20, 0 }
   0xf   : > { %p743_p8 = por %p65_p5, %p64_p3  ;;  %p126_p10 = scmp.eq.s32.totalorder %s433_s16, 1 }
  0x10   : > { %p747_p9 = por %p120_p6, %p58_p1  ;;  %p435_p12 = scmp.ge.s32.totalorder %s675_s14, 2 }
  0x11   : > { %s752_s23 = scalar_select %p49_p7, %s663_s11, %s51_s18  }
  0x12   : > { %p754_p11 = por %p126_p10, %p64_p3  ;;  %p467_p13 = scmp.lt.s32.totalorder %s675_s14, 2 }
  0x13   : > { %s146_s25 = sand.u32 1, %s663_s11   ;;  %s447_s27 = sshll.u32 %s671_s13, 5 }
  0x14   : > { %s436_s26 = sshll.u32 %s146_s25, 5  ;;  %s157_s30 = scalar_lea.hbm %s841_s0, %s447_s27 }
  0x15   : > { %s150_s3 = scalar_lea.vmem [#allocation3], %s436_s26  ;;  %s158_s5 = sshll.u32 %s157_s30, 4  ;;  %s159_s5 = int_to_ptr.hbm [resolvable:$true] %s158_s5 }
  0x16   : > { %s160_s4 = sshll.u32 %s150_s3, 4  ;;  %p767_p0 = pnand %p467_p13, %p737_p4  ;;  %s161_s4 = int_to_ptr.vmem [resolvable:$true] %s160_s4 }
  0x17   : > { %p441_p1 = scmp.ge.s32.totalorder %s675_s14, 1  ;;  %s147_s7 = scalar_lea.sflag [#allocation4], %s146_s25 }
  0x18   : > { %s677_s8 = smov 128   ;;  %s678_s15 = smov 8  }
  0x19   : > { %459 = dma.hbm_to_vmem [thread:$0]  (!%p767_p0), %s159_s5, 512, %s161_s4, %s147_s7, %s677_s8, %s677_s8, %s678_s15  }
  0x1a   : > { %p189_p2 = scmp.lt.s32.totalorder %s675_s14, 3  ;;  %s439_s16 = sshll.u32 %s146_s25, 3 }
  0x1b   : > { %s440_s18 = sshll.u32 %s671_s13, 3  ;;  %s174_s27 = scalar_lea.vmem [#allocation6], %s439_s16 }
  0x1c   : > { %p190_p3 = pnand %p441_p1, %p189_p2  ;;  %s180_s19 = scalar_lea.hbm %s842_s1, %s440_s18 }
  0x1d   : > { %s184_s28 = sshll.u32 %s174_s27, 4  ;;  %s182_s29 = sshll.u32 %s180_s19, 4  ;;  %s185_s28 = int_to_ptr.vmem [resolvable:$true] %s184_s28  ;;  %s183_s29 = int_to_ptr.hbm [resolvable:$true] %s182_s29 }
  0x1e   : > { %s171_s30 = scalar_lea.sflag [#allocation7], %s146_s25  ;;  %193 = sbr.rel (%p190_p3) target bundleno = 80 (0x50), region = 28 }
  0x1f   : > { %462 = dma.hbm_to_vmem [thread:$0]  (!%p767_p0), %s183_s29, 128, %s185_s28, %s171_s30  }
  0x20   : > { %s782_s3 = sand.u32 (!%p190_p3), 1, %s659_s10  }
  0x21   : > { %s442_s4 = sshll.u32 (!%p190_p3), %s782_s3, 5  ;;  %s196_s5 = scalar_lea.sflag (!%p190_p3), [#allocation4], %s782_s3 }
  0x22   : > { %s199_s7 = scalar_lea.vmem (!%p190_p3), [#allocation3], %s442_s4 }
  0x23   : > { %642 = dma.done.wait (%p743_p8), %s196_s5, 512  }
  0x24   : > { %644 = vsyncadd (%p743_p8), %s196_s5, 4294966784  ;;  %s443_s25 = sshll.u32 %s782_s3, 3  ;;  %s206_s6 = scalar_lea.sflag [#allocation7], %s782_s3 }
  0x25   : > { %s209_s8 = scalar_lea.vmem [#allocation6], %s443_s25 }
  0x26   : > { %646 = dma.done.wait (%p743_p8), %s206_s6, 128  }
  0x27   : > { %648 = vsyncadd (%p743_p8), %s206_s6, 4294967168  ;;  %s448_s15 = smul.u32 24, %s782_s3  ;;  %v245_v0 = vld [vmem:[%s199_s7] sm:$0xff]  ;;  %v246_v1 = vld [vmem:[%s199_s7 + $0x8] sm:$0xff]  ;;  %s300_s27 = scalar_lea.sflag [#allocation5], %s782_s3 }
  0x28   : > { %v247_v2 = vld [vmem:[%s199_s7 + $0x10] sm:$0xff]  ;;  %v248_v3 = vld [vmem:[%s199_s7 + $0x18] sm:$0xff]  ;;  %v249_v4 = vld [vmem:[%s209_s8] sm:$0xff]  ;;  %v250_v5 = vsub.f32 %v245_v0, %v246_v1  ;;  %s449_s21 = smul.u32 24, %s667_s12  ;;  %s609_s5 = scalar_lea.hbm %s843_s2, 48 }
  0x29   : > { %v254_v6 = vsub.f32 %v247_v2, %v246_v1  ;;  %v258_v7 = vsub.f32 %v248_v3, %v246_v1  ;;  %s797_s16 = scalar_lea.vmem [#allocation8], %s448_s15 }
  0x2a   : > { %298 = vst [vmem:[%s797_s16 + $0x10] sm:$0xff] %v249_v4  ;;  %v251_v8 = vmul.f32 1.442695, %v250_v5  ;;  %s313_s26 = scalar_lea.hbm %s843_s2, %s449_s21  ;;  %s314_s19 = sshll.u32 %s797_s16, 4  ;;  %s315_s19 = int_to_ptr.vmem [resolvable:$true] %s314_s19 }
  0x2b   : > { %v255_v9 = vmul.f32 1.442695, %v254_v6  ;;  %v259_v10 = vmul.f32 1.442695, %v258_v7  ;;  %s316_s12 = sshll.u32 %s313_s26, 4  ;;  %s317_s12 = int_to_ptr.hbm [resolvable:$true] %s316_s12 }
  0x2c   : > { %521 = vpow2.f32 %v251_v8  ;;  %s603_s28 = sshra.s32 %s317_s12, 4  ;;  %s604_s28 = int_to_ptr.hbm [resolvable:$true] %s603_s28 }
  0x2d   : > { %523 = vpow2.f32 %v255_v9  ;;  %s605_s29 = scalar_lea.hbm %s604_s28, 24  ;;  %p610_p7 = scmp.lt.s32.totalorder %s604_s28, %s843_s2 }
  0x2e   : > { %525 = vpow2.f32 %v259_v10  ;;  %p606_p4 = scmp.ne.s32.totalorder %s604_s28, %s605_s29  ;;  %p611_p8 = scmp.lt.s32.totalorder %s609_s5, %s605_s29 }
  0x30   : > { %p607_p5 = pnand %p606_p4, %p747_p9  ;;  %p612_p10 = por %p611_p8, %p610_p7 }
  0x32   : > { %v522_v11 = vpop.eup %521  ;;  %p608_p6 = pneg %p607_p5 }
  0x33   : > { %v524_v12 = vpop.eup %523  ;;  %v253_v13 = vadd.f32 1.0, %v522_v11 }
  0x34   : > { %v526_v14 = vpop.eup %525  ;;  %p613_p13 = pnand %p612_p10, %p608_p6 }
  0x35   : > { %v257_v15 = vadd.f32 %v524_v12, %v253_v13 }
  0x37   : > { %v261_v16 = vadd.f32 %v526_v14, %v257_v15 }
  0x39   : > { %527 = vrcp.f32 %v261_v16  ;;  %v273_v19 = vand.u32 2147483648, %v261_v16  ;;  %vm267_vm0 = vweird.f32 %v261_v16  ;;  %v271_v21 = vand.u32 2147483647, %v261_v16 }
  0x3b   : > { %v274_v23 = vor.u32 1.1754944e-38, %v273_v19  ;;  %vm272_vm3 = vcmp.eq.f32.partialorder %v271_v21, 8.507059e+37 }
  0x3f   : > { %v528_v17 = vpop.eup %527 }
  0x40   : > { %v263_v18 = vmul.f32 %v528_v17, %v261_v16  ;;  %vm268_vm1 = vweird.f32 %v528_v17 }
  0x41   : > { %vm269_vm2 = vmor %vm267_vm0, %vm268_vm1 }
  0x42   : > { %v264_v20 = vsub.f32 1.0, %v263_v18 }
  0x44   : > { %v265_v22 = vmul.f32 %v528_v17, %v264_v20 }
  0x46   : > { %v266_v24 = vadd.f32 %v528_v17, %v265_v22 }
  0x48   : > { %v270_v25 = vsel %vm269_vm2, %v528_v17, %v266_v24 }
  0x49   : > { %v275_v26 = vsel %vm272_vm3, %v274_v23, %v270_v25 }
  0x4a   : > { %v278_v27 = vmul.f32 %v275_v26, %v249_v4  ;;  %297 = vst [vmem:[%s797_s16 + $0x8] sm:$0xff] %v275_v26 }
  0x4c   : > { %296 = vst [vmem:[%s797_s16] sm:$0xff] %v278_v27 }
  0x4d   : > { %616 = shalt.err (!%p613_p13)
}
  0x4e   : > { %s679_s3 = smov 128   ;;  %s680_s6 = smov 8  }
  0x4f   : > { %454 = dma.vmem_to_hbm [thread:$0]  (%p747_p9), %s315_s19, 384, %s317_s12, %s300_s27, %s679_s3, %s679_s3, %s680_s6  }
  0x50 PF: > { %s331_s8 = sand.u32 1, %s655_s9   ;;  %p464_p0 = pnand %p435_p12, %p754_p11 }
  0x51   : > { %s332_s15 = scalar_lea.sflag [#allocation5], %s331_s8 }
  0x52   : > { %p465_p1 = pneg %p464_p0 }
  0x54   : > { %650 = dma.done.wait (%p465_p1), %s332_s15, 384  }
  0x55   : > { %652 = vsyncadd (%p465_p1), %s332_s15, 4294966912  ;;  %s21_s14 = sadd.s32 1, %s675_s14   ;;  %s849_s9 = smov %s659_s10 }
  0x56   : > { %p18_p2 = scmp.ge.s32.totalorder %s21_s14, 4   ;;  %s850_s10 = smov %s663_s11 }
  0x57   : > { %s851_s11 = smov %s752_s23  ;;  %s852_s12 = smov %s671_s13 }
  0x58   : > { %s853_s13 = smov %s855_s17  ;;  %20 = sbr.rel (!%p18_p2) target bundleno = 8 (0x8), region = 94 }
  0x5d   :  { %338 = vsyncpa [#allocation4], 1 }
  0x5e   :  { %340 = vsyncpa [#allocation4 + $0x1], 1 }
  0x5f   :  { %341 = vsyncpa [#allocation7], 1 }
  0x60   :  { %343 = vsyncpa [#allocation7 + $0x1], 1 }
  0x61   :  { %344 = vsyncpa [#allocation5], 1 }
  0x62   :  { %346 = vsyncpa [#allocation5 + $0x1], 1 }

</bundles_post_ra>
